<compile_context>
chip_gen: v7x
topology: tpu7x:2x2x1
jax: 0.10.0
libtpu: 0.0.40
codegen_flags: <defaults>
</compile_context>

<pallas_src>
import jax
import jax.numpy as jnp
from jax.experimental import pallas as pl
from jax.experimental.pallas import tpu as pltpu

LANE = 128          # lane-dense output slab width
IN_FEATURES = 187


def _mlp_kernel(x_ref, w01_ref, b01_ref, w2_ref, b2_ref, w3_ref, b3_ref, o_ref):
    # x tile arrives as f32 and is cast to bf16 in-kernel (no wrapper pass over x).
    x = x_ref[...].astype(jnp.bfloat16)

    # fused layer_0 + layer_1 (valid: no activation between them), then ReLU.
    h = jnp.dot(x, w01_ref[...], preferred_element_type=jnp.float32) + b01_ref[...]
    h = jnp.maximum(h, 0.0)

    # layer_2: Linear(50 -> 10) + ReLU (bf16 MXU operands, f32 accumulate/elementwise)
    h = jnp.dot(h.astype(jnp.bfloat16), w2_ref[...],
                preferred_element_type=jnp.float32) + b2_ref[...]
    h = jnp.maximum(h, 0.0)

    # layer_3: Linear(10 -> no_labels), padded to 128 lanes for a dense store.
    h = jnp.dot(h.astype(jnp.bfloat16), w3_ref[...],
                preferred_element_type=jnp.float32) + b3_ref[...]

    o_ref[...] = h.astype(o_ref.dtype)   # bf16 writeback (halves output HBM traffic)


def prepare_kernel_params(params):
    """One-time preparation of kernel-ready weights (hoist out of per-call path).

    params: list of (W(in,out), b(1,out)) f32 for the 4 Linear layers.
    Returns (w01_bf16, b01_f32, w2_bf16, b2_f32, w3p_bf16, b3p_f32).
    """
    (w0, b0), (w1, b1), (w2, b2), (w3, b3) = params
    no_labels = w3.shape[1]

    # offline algebraic fusion of layer_0 / layer_1 (no ReLU between them)
    w01 = (w0 @ w1).astype(jnp.bfloat16)          # (187, 50)
    b01 = b0 @ w1 + b1                            # (1, 50) f32

    # pad final layer to a lane-dense 128-wide output slab
    w3p = jnp.zeros((w3.shape[0], LANE), jnp.float32).at[:, :no_labels].set(w3)
    b3p = jnp.zeros((1, LANE), jnp.float32).at[:, :no_labels].set(b3)

    return (w01, b01, w2.astype(jnp.bfloat16), b2, w3p.astype(jnp.bfloat16), b3p)


def _choose_tile(B, tile_b):
    """Batch tile: multiple of 8, as large as tile_b allows, but with >= 2 grid
    steps when there is enough work (v7x has 2 TensorCores to shard across)."""
    tile_b = max(8, (tile_b // 8) * 8)
    b8 = pl.cdiv(B, 8) * 8
    if b8 <= 16:
        return b8
    half = pl.cdiv(pl.cdiv(b8, 2), 8) * 8
    return min(tile_b, half)


def ecg_classifier_forward(x, kparams, *, no_labels, tile_b=4096):
    """x: (B, 187) f32. kparams: output of prepare_kernel_params()."""
    w01, b01, w2, b2, w3p, b3p = kparams
    B = x.shape[0]

    tile = _choose_tile(B, tile_b)
    grid_n = pl.cdiv(B, tile)
    b_pad = grid_n * tile

    xp = x
    if b_pad != B:   # pad only when strictly needed (single wrapper pass)
        xp = jnp.zeros((b_pad, IN_FEATURES), x.dtype).at[:B].set(x)

    const = lambda i: (0, 0)   # weights/biases: VMEM resident, fetched once

    compiler_params = pltpu.CompilerParams(
        dimension_semantics=("parallel",),
        # v5e's default scoped-VMEM limit (16 MiB) is too small for big tiles.
        vmem_limit_bytes=(48 * 1024 * 1024) if tile >= 2048 else None,
    )

    out = pl.pallas_call(
        _mlp_kernel,
        out_shape=jax.ShapeDtypeStruct((b_pad, LANE), jnp.bfloat16),
        grid=(grid_n,),
        in_specs=[
            pl.BlockSpec((tile, IN_FEATURES), lambda i: (i, 0)),   # x (streamed, f32)
            pl.BlockSpec((IN_FEATURES, 50), const),                # W01 bf16
            pl.BlockSpec((1, 50), const),                          # b01 f32
            pl.BlockSpec((50, 10), const),                         # W2 bf16
            pl.BlockSpec((1, 10), const),                          # b2 f32
            pl.BlockSpec((10, LANE), const),                       # W3 bf16 (padded)
            pl.BlockSpec((1, LANE), const),                        # b3 f32 (padded)
        ],
        out_specs=pl.BlockSpec((tile, LANE), lambda i: (i, 0)),
        compiler_params=compiler_params,
    )(xp, w01, b01, w2, b2, w3p, b3p)

    return out[:B, :no_labels].astype(jnp.float32)


def init_params(key, no_labels):
    """Deterministic init of the 4 Linear layers; weights stored as (in, out)."""
    dims = [(IN_FEATURES, 100), (100, 50), (50, 10), (10, no_labels)]
    params = []
    for i, (fan_in, fan_out) in enumerate(dims):
        kw, kb = jax.random.split(jax.random.fold_in(key, i))
        bound = 1.0 / (fan_in ** 0.5)   # same scale as PyTorch's default Linear init
        w = jax.random.uniform(kw, (fan_in, fan_out), jnp.float32, -bound, bound)
        b = jax.random.uniform(kb, (1, fan_out), jnp.float32, -bound, bound)
        params.append((w, b))
    return params


def reference_forward(x, params):
    """Plain-JAX f32 reference that mirrors the PyTorch forward exactly."""
    (w0, b0), (w1, b1), (w2, b2), (w3, b3) = params
    h = x @ w0 + b0                      # layer_0 (no activation)
    h = jnp.maximum(h @ w1 + b1, 0.0)    # relu(layer_1)
    h = jnp.maximum(h @ w2 + b2, 0.0)    # relu(layer_2)
    return h @ w3 + b3                   # layer_3


if __name__ == "__main__":
    key = jax.random.PRNGKey(0)
    k_x, k_p = jax.random.split(key)

    no_labels = 5
    batch = 8
    x = jax.random.normal(k_x, (batch, IN_FEATURES), jnp.float32)
    params = init_params(k_p, no_labels)

    kparams = prepare_kernel_params(params)              # hoisted: once per model
    kparams = jax.tree_util.tree_map(jax.block_until_ready, kparams)

    fwd = jax.jit(ecg_classifier_forward, static_argnames=("no_labels", "tile_b"))
    out = fwd(x, kparams, no_labels=no_labels)
    out = jax.block_until_ready(out)

    ref = reference_forward(x, params)
    assert out.shape == (batch, no_labels)
    assert out.dtype == jnp.float32
    # bf16 matmul operands / bf16 output store with f32 accumulation -> relaxed tol
    assert jnp.allclose(out, ref, atol=5e-2, rtol=5e-2), "Pallas output mismatch vs reference"

    print("KERNEL_OK")
</pallas_src>

<mosaic_0001>
module attributes {stable_mosaic.version = 11 : i64} {
  func.func @_mlp_kernel(%arg0: i32, %arg1: memref<8x187xf32, #tpu.memory_space<vmem>>, %arg2: memref<187x50xbf16, #tpu.memory_space<vmem>>, %arg3: memref<1x50xf32, #tpu.memory_space<vmem>>, %arg4: memref<50x10xbf16, #tpu.memory_space<vmem>>, %arg5: memref<1x10xf32, #tpu.memory_space<vmem>>, %arg6: memref<10x128xbf16, #tpu.memory_space<vmem>>, %arg7: memref<1x128xf32, #tpu.memory_space<vmem>>, %arg8: memref<8x128xbf16, #tpu.memory_space<vmem>>) attributes {dimension_semantics = [#tpu.dimension_semantics<parallel>], iteration_bounds = array<i64: 1>, scalar_prefetch = 0 : i64, scratch_operands = 0 : i64, tpu.core_type = #tpu.core_type<tc>, window_params = [{transform_indices = @transform_0, window_bounds = array<i64: 8, 187>}, {pipeline_mode = #tpu.pipeline_mode<synchronous>, transform_indices = @transform_1, window_bounds = array<i64: 187, 50>}, {pipeline_mode = #tpu.pipeline_mode<synchronous>, transform_indices = @transform_2, window_bounds = array<i64: 1, 50>}, {pipeline_mode = #tpu.pipeline_mode<synchronous>, transform_indices = @transform_3, window_bounds = array<i64: 50, 10>}, {pipeline_mode = #tpu.pipeline_mode<synchronous>, transform_indices = @transform_4, window_bounds = array<i64: 1, 10>}, {pipeline_mode = #tpu.pipeline_mode<synchronous>, transform_indices = @transform_5, window_bounds = array<i64: 10, 128>}, {pipeline_mode = #tpu.pipeline_mode<synchronous>, transform_indices = @transform_6, window_bounds = array<i64: 1, 128>}, {transform_indices = @transform_7, window_bounds = array<i64: 8, 128>}]} {
    %c0 = arith.constant 0 : index
    %c0_0 = arith.constant 0 : index
    %0 = vector.load %arg1[%c0, %c0_0] : memref<8x187xf32, #tpu.memory_space<vmem>>, vector<8x187xf32>
    %1 = arith.truncf %0 : vector<8x187xf32> to vector<8x187xbf16>
    %c0_1 = arith.constant 0 : index
    %c0_2 = arith.constant 0 : index
    %2 = vector.load %arg2[%c0_1, %c0_2] : memref<187x50xbf16, #tpu.memory_space<vmem>>, vector<187x50xbf16>
    %cst = arith.constant dense<0.000000e+00> : vector<8x50xf32>
    %3 = tpu.matmul %1, %2, %cst {dimension_numbers = #tpu.dot_dimension_numbers<[1], [0], [0], [1], [0, 0, 1, 1], [], []>} : vector<8x187xbf16>, vector<187x50xbf16>, vector<8x50xf32> -> vector<8x50xf32>
    %c0_3 = arith.constant 0 : index
    %c0_4 = arith.constant 0 : index
    %4 = vector.load %arg3[%c0_3, %c0_4] : memref<1x50xf32, #tpu.memory_space<vmem>>, vector<1x50xf32>
    %5 = vector.broadcast %4 : vector<1x50xf32> to vector<8x50xf32>
    %6 = arith.addf %3, %5 : vector<8x50xf32>
    %cst_5 = arith.constant 0.000000e+00 : f32
    %7 = vector.broadcast %cst_5 : f32 to vector<8x50xf32>
    %8 = arith.maximumf %6, %7 : vector<8x50xf32>
    %9 = arith.truncf %8 : vector<8x50xf32> to vector<8x50xbf16>
    %c0_6 = arith.constant 0 : index
    %c0_7 = arith.constant 0 : index
    %10 = vector.load %arg4[%c0_6, %c0_7] : memref<50x10xbf16, #tpu.memory_space<vmem>>, vector<50x10xbf16>
    %cst_8 = arith.constant dense<0.000000e+00> : vector<8x10xf32>
    %11 = tpu.matmul %9, %10, %cst_8 {dimension_numbers = #tpu.dot_dimension_numbers<[1], [0], [0], [1], [0, 0, 1, 1], [], []>} : vector<8x50xbf16>, vector<50x10xbf16>, vector<8x10xf32> -> vector<8x10xf32>
    %c0_9 = arith.constant 0 : index
    %c0_10 = arith.constant 0 : index
    %12 = vector.load %arg5[%c0_9, %c0_10] : memref<1x10xf32, #tpu.memory_space<vmem>>, vector<1x10xf32>
    %13 = vector.broadcast %12 : vector<1x10xf32> to vector<8x10xf32>
    %14 = arith.addf %11, %13 : vector<8x10xf32>
    %cst_11 = arith.constant 0.000000e+00 : f32
    %15 = vector.broadcast %cst_11 : f32 to vector<8x10xf32>
    %16 = arith.maximumf %14, %15 : vector<8x10xf32>
    %17 = arith.truncf %16 : vector<8x10xf32> to vector<8x10xbf16>
    %c0_12 = arith.constant 0 : index
    %c0_13 = arith.constant 0 : index
    %18 = vector.load %arg6[%c0_12, %c0_13] : memref<10x128xbf16, #tpu.memory_space<vmem>>, vector<10x128xbf16>
    %cst_14 = arith.constant dense<0.000000e+00> : vector<8x128xf32>
    %19 = tpu.matmul %17, %18, %cst_14 {dimension_numbers = #tpu.dot_dimension_numbers<[1], [0], [0], [1], [0, 0, 1, 1], [], []>} : vector<8x10xbf16>, vector<10x128xbf16>, vector<8x128xf32> -> vector<8x128xf32>
    %c0_15 = arith.constant 0 : index
    %c0_16 = arith.constant 0 : index
    %20 = vector.load %arg7[%c0_15, %c0_16] : memref<1x128xf32, #tpu.memory_space<vmem>>, vector<1x128xf32>
    %21 = vector.broadcast %20 : vector<1x128xf32> to vector<8x128xf32>
    %22 = arith.addf %19, %21 : vector<8x128xf32>
    %23 = arith.truncf %22 : vector<8x128xf32> to vector<8x128xbf16>
    %c0_17 = arith.constant 0 : index
    %c0_18 = arith.constant 0 : index
    %24 = vector.load %arg8[%c0_17, %c0_18] : memref<8x128xbf16, #tpu.memory_space<vmem>>, vector<8x128xbf16>
    tpu.vector_store %arg8[%c0_17, %c0_18], %23 {strides = array<i32>} : memref<8x128xbf16, #tpu.memory_space<vmem>>, vector<8x128xbf16>,
    return
  }
  func.func @transform_0(%arg0: i32) -> (i32, i32) {
    %c0_i32 = arith.constant 0 : i32
    %c0_i32_0 = arith.constant 0 : i32
    return %arg0, %c0_i32 : i32, i32
  }
  func.func @transform_1(%arg0: i32) -> (i32, i32) {
    %c0_i32 = arith.constant 0 : i32
    %c0_i32_0 = arith.constant 0 : i32
    %c0_i32_1 = arith.constant 0 : i32
    return %c0_i32, %c0_i32_0 : i32, i32
  }
  func.func @transform_2(%arg0: i32) -> (i32, i32) {
    %c0_i32 = arith.constant 0 : i32
    %c0_i32_0 = arith.constant 0 : i32
    %c0_i32_1 = arith.constant 0 : i32
    return %c0_i32, %c0_i32_0 : i32, i32
  }
  func.func @transform_3(%arg0: i32) -> (i32, i32) {
    %c0_i32 = arith.constant 0 : i32
    %c0_i32_0 = arith.constant 0 : i32
    %c0_i32_1 = arith.constant 0 : i32
    return %c0_i32, %c0_i32_0 : i32, i32
  }
  func.func @transform_4(%arg0: i32) -> (i32, i32) {
    %c0_i32 = arith.constant 0 : i32
    %c0_i32_0 = arith.constant 0 : i32
    %c0_i32_1 = arith.constant 0 : i32
    return %c0_i32, %c0_i32_0 : i32, i32
  }
  func.func @transform_5(%arg0: i32) -> (i32, i32) {
    %c0_i32 = arith.constant 0 : i32
    %c0_i32_0 = arith.constant 0 : i32
    %c0_i32_1 = arith.constant 0 : i32
    return %c0_i32, %c0_i32_0 : i32, i32
  }
  func.func @transform_6(%arg0: i32) -> (i32, i32) {
    %c0_i32 = arith.constant 0 : i32
    %c0_i32_0 = arith.constant 0 : i32
    %c0_i32_1 = arith.constant 0 : i32
    return %c0_i32, %c0_i32_0 : i32, i32
  }
  func.func @transform_7(%arg0: i32) -> (i32, i32) {
    %c0_i32 = arith.constant 0 : i32
    %c0_i32_0 = arith.constant 0 : i32
    return %arg0, %c0_i32 : i32, i32
  }
}

</mosaic_0001>

<bundles_post_ra>
// kernel: ecg_classifier_forward.1
= control target key start
LH: loop header
LB: loop body
LE: loop exit
PB: predicated region body
PF: predicated region fallthrough
CT: control target
= control target key end

     0   :  { %v407_v0 = vmov 0   ;;  %v408_v3 = vmov 0.0   ;;  %vm133_vm0 = vcmask 482304   ;;  %vm137_vm1 = vcmask 1044480   ;;  %s531_s1 = inlined_call_operand.vmem [shape: bf16[187,50], index: 1, kind: input, shape index: {}]   ;;  %s532_s0 = inlined_call_operand.vmem [shape: f32[8,187], index: 0, kind: input, shape index: {}]   ;;  %s533_s3 = inlined_call_operand.vmem [shape: bf16[50,10], index: 3, kind: input, shape index: {}]   ;;  %s534_s5 = inlined_call_operand.vmem [shape: bf16[10,128], index: 5, kind: input, shape index: {}]   ;;  %s535_s2 = inlined_call_operand.vmem [shape: f32[1,50], index: 2, kind: input, shape index: {}]   ;;  %s536_s4 = inlined_call_operand.vmem [shape: f32[1,10], index: 4, kind: input, shape index: {}]   ;;  %s537_s6 = inlined_call_operand.vmem [shape: f32[1,128], index: 6, kind: input, shape index: {}]   ;;  %s538_s7 = inlined_call_operand.vmem [shape: bf16[8,128], index: 7, kind: output, shape index: {}]  }
   0x1   :  { %144 = vmatprep.subr.bf16.mxu0 %v407_v0  ;;  %v390_v1 = vld [vmem:[%s531_s1] sm:$0xff]   ;;  %v391_v2 = vld [vmem:[%s531_s1 + $0x8] sm:$0xff]   ;;  %368 = vmatprep.subr.bf16.mxu1 %v408_v3  ;;  %v392_v4 = vld [vmem:[%s531_s1 + $0x10] sm:$0xff]   ;;  %vm138_vm2 = vcmask 1045504   ;;  %v409_v16 = vmov 65535   ;;  %vm225_vm3 = vcmask 1040384  }
   0x2   :  { %145 = vmatpush1.bf16.msra.mxu0 %v390_v1  ;;  %v393_v5 = vld [vmem:[%s531_s1 + $0x18] sm:$0xff]   ;;  %v28_v6 = vld [vmem:[%s532_s0 + $0x8] sm:$0xff]  ;;  %v402_v8 = vld [vmem:[%s533_s3] sm:$0xff]   ;;  %v139_v17 = vsel %vm137_vm1, 4294967295, %v409_v16  ;;  %vm410_vm4 = vmmov 0   ;;  %vm221_vm5 = vcmask 408576  }
   0x3   :  { %146 = vmatprep.subr.bf16.mxu0 %v407_v0  ;;  %v30_v7 = vpack.c.bf16 %v28_v6, %v28_v6  ;;  %v394_v9 = vld [vmem:[%s531_s1 + $0x20] sm:$0xff]   ;;  %369 = vmatpush3.bf16.msra.mxu1 %v402_v8  ;;  %v403_v10 = vld [vmem:[%s533_s3 + $0x8] sm:$0xff]   ;;  %v396_v12 = vld [vmem:[%s531_s1 + $0x30] sm:$0xff]   ;;  %v140_v20 = vsel %vm138_vm2, %v139_v17, 0  ;;  %vm285_vm6 = vcmask 80896  }
   0x4   :  { %370 = vmatprep.subr.bf16.mxu1 %v408_v3  ;;  %v395_v11 = vld [vmem:[%s531_s1 + $0x28] sm:$0xff]   ;;  %v397_v13 = vld [vmem:[%s531_s1 + $0x38] sm:$0xff]   ;;  %v398_v14 = vld [vmem:[%s531_s1 + $0x40] sm:$0xff]   ;;  %376 = vmatprep.mubr.msk.bf16.mxu1 %vm410_vm4, %v408_v3 }
   0x5   :  { %351 = vmatprep.mubr.msk.bf16.mxu0 %vm133_vm0, %v30_v7  ;;  %v399_v15 = vld [vmem:[%s531_s1 + $0x48] sm:$0xff]   ;;  %v400_v18 = vld [vmem:[%s531_s1 + $0x50] sm:$0xff]   ;;  %v401_v19 = vld [vmem:[%s531_s1 + $0x58] sm:$0x3f]  }
   0x6   :  { %147 = vmatpush1.bf16.msra.mxu0 %v391_v2  ;;  %v142_v21 = vand.u32 %v401_v19, %v140_v20  ;;  %v27_v22 = vld [vmem:[%s532_s0] sm:$0xff]  ;;  %v404_v24 = vld [vmem:[%s533_s3 + $0x10] sm:$0xff]   ;;  %v405_v25 = vld [vmem:[%s533_s3 + $0x18] ss:$0 sps:$4 sm:$0x11]  }
   0x7   :  { %148 = vmatprep.subr.bf16.mxu0 %v407_v0  ;;  %371 = vmatpush3.bf16.msra.mxu1 %v403_v10  ;;  %v29_v23 = vpack.c.bf16 %v27_v22, %v27_v22  ;;  %v227_v26 = vsel %vm225_vm3, %v405_v25, 0  ;;  %v338_v27 = vld [vmem:[%s535_s2] ss:$0 sm:$0xff] }
   0x8   :  { %372 = vmatprep.subr.bf16.mxu1 %v408_v3  ;;  %v406_v31 = vld [vmem:[%s534_s5] sm:$0x1f]  }
   0x9   :  { %v290_v36 = vsel %vm137_vm1, %v406_v31, 0  ;;  %v352_v37 = vld [vmem:[%s536_s4] ss:$0 sm:$0xff] }
   0xa   :  { %149 = vmatpush1.bf16.msra.mxu0 %v392_v4  ;;  %v358_v45 = vld [vmem:[%s537_s6] ss:$0 sm:$0xff] }
   0xb   :  { %150 = vmatprep.subr.bf16.mxu0 %v407_v0  ;;  %373 = vmatpush3.bf16.msra.mxu1 %v404_v24 }
   0xc   :  { %374 = vmatprep.subr.bf16.mxu1 %v408_v3 }
   0xe   :  { %151 = vmatpush1.bf16.msra.mxu0 %v393_v5 }
   0xf   :  { %152 = vmatprep.subr.bf16.mxu0 %v407_v0  ;;  %375 = vmatpush3.bf16.msra.mxu1 %v227_v26 }
  0x10   :  { %380 = vmatprep.subr.bf16.mxu1 %v408_v3 }
  0x12   :  { %153 = vmatpush1.bf16.msra.mxu0 %v394_v9 }
  0x13   :  { %154 = vmatprep.subr.bf16.mxu0 %v407_v0 }
  0x16   :  { %155 = vmatpush1.bf16.msra.mxu0 %v395_v11 }
  0x17   :  { %156 = vmatprep.subr.bf16.mxu0 %v407_v0 }
  0x1a   :  { %157 = vmatpush1.bf16.msra.mxu0 %v396_v12 }
  0x1b   :  { %158 = vmatprep.subr.bf16.mxu0 %v407_v0 }
  0x1e   :  { %159 = vmatpush1.bf16.msra.mxu0 %v397_v13 }
  0x1f   :  { %160 = vmatprep.subr.bf16.mxu0 %v407_v0 }
  0x22   :  { %161 = vmatpush1.bf16.msra.mxu0 %v398_v14 }
  0x23   :  { %162 = vmatprep.subr.bf16.mxu0 %v407_v0 }
  0x26   :  { %163 = vmatpush1.bf16.msra.mxu0 %v399_v15 }
  0x27   :  { %164 = vmatprep.subr.bf16.mxu0 %v407_v0 }
  0x2a   :  { %165 = vmatpush1.bf16.msra.mxu0 %v400_v18 }
  0x2b   :  { %166 = vmatprep.subr.bf16.mxu0 %v407_v0 }
  0x2e   :  { %167 = vmatpush1.bf16.msra.mxu0 %v142_v21 }
  0x31   :  { %177 = vmatmul.mubr.bf16.vlgmr.msra.gmra.mrb[0].mxu0 %v29_v23 }
 0x104   :  { %v178_v28 = vpop.f32.mrb[0].mxu0 }
 0x105   :  { %v179_v29 = vadd.f32 %v338_v27, %v178_v28  ;;  %v180_v30 = vpop.f32.mrb[1].mxu0 }
 0x106   :  { %v181_v32 = vpop.f32.mrb[2].mxu0 }
 0x107   :  { %v184_v33 = vmax.f32 %v179_v29, 0.0  ;;  %v182_v34 = vpop.f32.mrb[3].mxu0 }
 0x109   :  { %v185_v35 = vpack.c.bf16 %v184_v33, %v184_v33 }
 0x10b   :  { %377 = vmatmul.mubr.msk.bf16.vlgmr.msra.gmra.mrb[0].mxu1 %vm221_vm5, %v185_v35 }
 0x10c   :  { %381 = vmatpush3.bf16.msra.mxu1 %v290_v36  ;;  %382 = vmatprep.mubr.msk.bf16.mxu1 %vm410_vm4, %v408_v3 }
 0x1de   :  { %v263_v38 = vpop.f32.mrb[0].mxu1 }
 0x1df   :  { %v264_v39 = vadd.f32 %v352_v37, %v263_v38  ;;  %v378_v40 = vpop.f32.mrb[1].mxu1 }
 0x1e0   :  { %v266_v41 = vpop.f32.mrb[2].mxu1 }
 0x1e1   :  { %v269_v42 = vmax.f32 %v264_v39, 0.0  ;;  %v379_v43 = vpop.f32.mrb[3].mxu1 }
 0x1e3   :  { %v270_v44 = vpack.c.bf16 %v269_v42, %v269_v42 }
 0x1e5   :  { %383 = vmatmul.mubr.msk.bf16.vlgmr.msra.gmra.mrb[4].mxu1 %vm285_vm6, %v270_v44 }
 0x2b8   :  { %v326_v46 = vpop.f32.mrb[4].mxu1 }
 0x2b9   :  { %v327_v47 = vadd.f32 %v358_v45, %v326_v46  ;;  %v384_v48 = vpop.f32.mrb[5].mxu1 }
 0x2ba   :  { %v329_v49 = vpop.f32.mrb[6].mxu1 }
 0x2bb   :  { %v332_v50 = vpack.c.bf16 %v327_v47, %v327_v47  ;;  %v385_v51 = vpop.f32.mrb[7].mxu1 }
 0x2bd   :  { %333 = vst [vmem:[%s538_s7] sm:$0xf] %v332_v50 }

</bundles_post_ra>
